<compile_context>
chip_gen: v7x
topology: tpu7x:2x2x1
jax: 0.10.0
libtpu: 0.0.40
codegen_flags: <defaults>
</compile_context>

<pallas_src>
import functools
import math

import jax
import jax.numpy as jnp
import numpy as np
from jax import lax
from jax.experimental import pallas as pl
from jax.experimental.pallas import tpu as pltpu


def patch_merging_kernel(x_ref, we_ref, wo_ref, bw_ref, out_ref, *, eps):
    """Fused 2x2 patch-merge + LayerNorm(4C) + Linear(4C->2C), one row tile.

    x_ref:   (TP, 2, W/2, 2C)  TP image-row-pairs; dim1 = even/odd image row;
                               last dim packs two horizontally adjacent pixels.
    we_ref:  (2C, 2C) bf16     gamma-folded weight rows for even image rows.
    wo_ref:  (2C, 2C) bf16     gamma-folded weight rows for odd image rows.
    bw_ref:  (1, 2C)  f32      beta @ W.
    out_ref: (TP*W/2, 2C)      merged-pixel output rows.
    """
    tp, _, wq, c2 = x_ref.shape
    m = tp * wq
    inv_4c = 1.0 / (2.0 * c2)

    xt = x_ref[...].astype(jnp.float32)                 # (TP, 2, wq, 2C)
    e = xt[:, 0].reshape(m, c2)                         # [x0 | x2] per merged pixel
    o = xt[:, 1].reshape(m, c2)                         # [x1 | x3] per merged pixel

    # LayerNorm statistics over the virtual 4C merged channel (f32, two-pass).
    mean = (jnp.sum(e, axis=-1, keepdims=True)
            + jnp.sum(o, axis=-1, keepdims=True)) * inv_4c
    ec = e - mean
    oc = o - mean
    var = (jnp.sum(ec * ec, axis=-1, keepdims=True)
           + jnp.sum(oc * oc, axis=-1, keepdims=True)) * inv_4c
    r = lax.rsqrt(var + eps)                            # (m, 1)  EUP

    # gamma folded into we/wo, beta folded into bw = beta @ W.
    acc = jnp.dot(ec.astype(jnp.bfloat16), we_ref[...],
                  preferred_element_type=jnp.float32)
    acc = acc + jnp.dot(oc.astype(jnp.bfloat16), wo_ref[...],
                        preferred_element_type=jnp.float32)
    out_ref[...] = (r * acc + bw_ref[...]).astype(out_ref.dtype)


def _choose_block_pairs(num_pairs, wq, target_rows=1024):
    """Pick image-row-pairs per grid step.

    Constraints: (TP * W/2) % 8 == 0 so the 2D output block is sublane
    aligned, TP divides num_pairs (no padding -> no extra HBM copies), and the
    grid keeps >= 2 steps when there is enough work (v7x megacore sharding).
    """
    unit = 8 // math.gcd(wq, 8)
    if num_pairs % unit != 0:
        return num_pairs                      # single block: always layout-legal
    tp = (max(target_rows, wq) // wq) // unit * unit
    tp = max(unit, min(tp, num_pairs))
    if num_pairs // tp < 2 and num_pairs >= 2 * unit:
        tp = max(unit, (num_pairs // 2) // unit * unit)
    while num_pairs % tp != 0:                # largest dividing multiple of unit
        tp -= unit
    return tp


def patch_merging_pallas(x, gamma, beta, w_red, input_resolution, eps=1e-5,
                         *, out_dtype=None, target_block_rows=1024):
    """PatchMerging forward.

    x:      (B, H*W, C)  f32 or bf16
    gamma:  (4C,) LayerNorm weight;  beta: (4C,) LayerNorm bias
    w_red:  (2C, 4C)  nn.Linear(4C, 2C, bias=False).weight (PyTorch layout)
    returns (B, H*W//4, 2C) in out_dtype (default: x.dtype)
    """
    H, W = input_resolution
    B, L, C = x.shape
    assert L == H * W, "input feature has wrong size"
    assert H % 2 == 0 and W % 2 == 0, "spatial size must be even"
    if out_dtype is None:
        out_dtype = x.dtype
    wq = W // 2
    c2, c4, cout = 2 * C, 4 * C, 2 * C
    n_pairs = B * H // 2
    m_out = n_pairs * wq

    # Free view (no data movement): dim1 separates even/odd image rows of each
    # 2x2 block; the last dim packs two horizontally adjacent pixels.
    xs = x.reshape(n_pairs, 2, wq, c2)

    # Fold LN gamma into the projection and split it by even/odd image row so
    # the 2x2 gather never has to happen.
    wt = jnp.transpose(w_red).astype(jnp.float32)                 # (4C, 2C)
    wg = gamma.astype(jnp.float32)[:, None] * wt
    we = jnp.concatenate([wg[0:C], wg[2 * C:3 * C]], axis=0).astype(jnp.bfloat16)
    wo = jnp.concatenate([wg[C:2 * C], wg[3 * C:4 * C]], axis=0).astype(jnp.bfloat16)
    bw = (beta.astype(jnp.float32) @ wt).reshape(1, cout)

    tp = _choose_block_pairs(n_pairs, wq, target_block_rows)
    grid = (n_pairs // tp,)
    blk_rows = tp * wq

    out_itemsize = jnp.dtype(out_dtype).itemsize
    in_blk = tp * 2 * wq * c2 * x.dtype.itemsize
    out_blk = blk_rows * cout * out_itemsize
    w_bytes = 2 * c2 * cout * 2 + cout * 4
    vmem_need = (2 * in_blk + 2 * out_blk + w_bytes
                 + blk_rows * (3 * c2 + cout) * 4 + (4 << 20))
    vmem_limit = int(min(max(vmem_need, 32 << 20), 64 << 20))

    cost = pl.CostEstimate(
        flops=2 * m_out * c4 * cout + 8 * m_out * c4,
        transcendentals=m_out,
        bytes_accessed=int(x.size) * x.dtype.itemsize
                       + m_out * cout * out_itemsize + w_bytes)

    out2d = pl.pallas_call(
        functools.partial(patch_merging_kernel, eps=eps),
        out_shape=jax.ShapeDtypeStruct((m_out, cout), out_dtype),
        grid=grid,
        in_specs=[
            pl.BlockSpec((tp, 2, wq, c2), lambda i: (i, 0, 0, 0)),
            pl.BlockSpec((c2, cout), lambda i: (0, 0)),
            pl.BlockSpec((c2, cout), lambda i: (0, 0)),
            pl.BlockSpec((1, cout), lambda i: (0, 0)),
        ],
        out_specs=pl.BlockSpec((blk_rows, cout), lambda i: (i, 0)),
        compiler_params=pltpu.CompilerParams(
            dimension_semantics=("parallel",),
            vmem_limit_bytes=vmem_limit),
        cost_estimate=cost,
    )(xs, we, wo, bw)

    return out2d.reshape(B, L // 4, cout)


def patch_merging_reference(x, gamma, beta, w_red, input_resolution, eps=1e-5):
    """Pure-JAX reference matching the PyTorch module exactly (all f32)."""
    H, W = input_resolution
    B, L, C = x.shape
    xv = x.astype(jnp.float32).reshape(B, H, W, C)
    x0 = xv[:, 0::2, 0::2, :]
    x1 = xv[:, 1::2, 0::2, :]
    x2 = xv[:, 0::2, 1::2, :]
    x3 = xv[:, 1::2, 1::2, :]
    xm = jnp.concatenate([x0, x1, x2, x3], axis=-1).reshape(B, -1, 4 * C)
    mean = jnp.mean(xm, axis=-1, keepdims=True)
    var = jnp.mean((xm - mean) ** 2, axis=-1, keepdims=True)
    y = (xm - mean) / jnp.sqrt(var + eps) * gamma + beta
    return y @ w_red.T


if __name__ == "__main__":
    # PatchMerging(input_resolution=(16, 16), dim=64) at batch 2.
    B, H, W, dim = 2, 16, 16, 64
    C4, C2out = 4 * dim, 2 * dim

    key = jax.random.PRNGKey(0)
    k0, k1, k2, k3 = jax.random.split(key, 4)
    x = jax.random.normal(k0, (B, H * W, dim), jnp.float32)
    gamma = 1.0 + 0.05 * jax.random.normal(k1, (C4,), jnp.float32)   # LN weight
    beta = 0.05 * jax.random.normal(k2, (C4,), jnp.float32)          # LN bias
    w_red = 0.05 * jax.random.normal(k3, (C2out, C4), jnp.float32)   # Linear.weight

    ref = jax.block_until_ready(
        patch_merging_reference(x, gamma, beta, w_red, (H, W)))

    # f32-in / f32-out path (matches the PyTorch module up to the bf16 MXU).
    out = jax.block_until_ready(patch_merging_pallas(x, gamma, beta, w_red, (H, W)))
    np.testing.assert_allclose(np.asarray(out), np.asarray(ref),
                               rtol=2e-2, atol=2e-2)

    # bf16 activation I/O path (recommended when the surrounding model is bf16):
    # ~2x less HBM traffic for this memory-bound op at ~1e-2-level extra error.
    out_bf16 = jax.block_until_ready(
        patch_merging_pallas(x.astype(jnp.bfloat16), gamma, beta, w_red, (H, W),
                             out_dtype=jnp.bfloat16))
    np.testing.assert_allclose(np.asarray(out_bf16.astype(jnp.float32)),
                               np.asarray(ref), rtol=1e-1, atol=1e-1)

    print("KERNEL_OK")
</pallas_src>

<mosaic_0001>
module attributes {stable_mosaic.version = 11 : i64} {
  func.func @patch_merging_kernel(%arg0: i32, %arg1: memref<8x2x8x128xf32, #tpu.memory_space<vmem>>, %arg2: memref<128x128xbf16, #tpu.memory_space<vmem>>, %arg3: memref<128x128xbf16, #tpu.memory_space<vmem>>, %arg4: memref<1x128xf32, #tpu.memory_space<vmem>>, %arg5: memref<64x128xf32, #tpu.memory_space<vmem>>) attributes {dimension_semantics = [#tpu.dimension_semantics<parallel>], iteration_bounds = array<i64: 2>, scalar_prefetch = 0 : i64, scratch_operands = 0 : i64, tpu.core_type = #tpu.core_type<tc>, window_params = [{transform_indices = @transform_0, window_bounds = array<i64: 8, 2, 8, 128>}, {pipeline_mode = #tpu.pipeline_mode<synchronous>, transform_indices = @transform_1, window_bounds = array<i64: 128, 128>}, {pipeline_mode = #tpu.pipeline_mode<synchronous>, transform_indices = @transform_2, window_bounds = array<i64: 128, 128>}, {pipeline_mode = #tpu.pipeline_mode<synchronous>, transform_indices = @transform_3, window_bounds = array<i64: 1, 128>}, {transform_indices = @transform_4, window_bounds = array<i64: 64, 128>}]} {
    %c0 = arith.constant 0 : index
    %c0_0 = arith.constant 0 : index
    %c0_1 = arith.constant 0 : index
    %c0_2 = arith.constant 0 : index
    %0 = vector.load %arg1[%c0, %c0_0, %c0_1, %c0_2] : memref<8x2x8x128xf32, #tpu.memory_space<vmem>>, vector<8x2x8x128xf32>
    %1 = vector.extract_strided_slice %0 {offsets = [0, 0, 0, 0], sizes = [8, 1, 8, 128], strides = [1, 1, 1, 1]} : vector<8x2x8x128xf32> to vector<8x1x8x128xf32>
    %2 = vector.shape_cast %1 : vector<8x1x8x128xf32> to vector<8x8x128xf32>
    %3 = vector.shape_cast %2 : vector<8x8x128xf32> to vector<64x128xf32>
    %4 = vector.extract_strided_slice %0 {offsets = [0, 1, 0, 0], sizes = [8, 1, 8, 128], strides = [1, 1, 1, 1]} : vector<8x2x8x128xf32> to vector<8x1x8x128xf32>
    %5 = vector.shape_cast %4 : vector<8x1x8x128xf32> to vector<8x8x128xf32>
    %6 = vector.shape_cast %5 : vector<8x8x128xf32> to vector<64x128xf32>
    %cst = arith.constant dense<0.000000e+00> : vector<64xf32>
    %7 = vector.multi_reduction <add>, %3, %cst [1] : vector<64x128xf32> to vector<64xf32>
    %8 = vector.shape_cast %7 : vector<64xf32> to vector<64x1xf32>
    %cst_3 = arith.constant dense<0.000000e+00> : vector<64xf32>
    %9 = vector.multi_reduction <add>, %6, %cst_3 [1] : vector<64x128xf32> to vector<64xf32>
    %10 = vector.shape_cast %9 : vector<64xf32> to vector<64x1xf32>
    %11 = arith.addf %8, %10 : vector<64x1xf32>
    %cst_4 = arith.constant 3.906250e-03 : f32
    %12 = vector.broadcast %cst_4 : f32 to vector<64x1xf32>
    %13 = arith.mulf %11, %12 : vector<64x1xf32>
    %14 = vector.broadcast %13 : vector<64x1xf32> to vector<64x128xf32>
    %15 = arith.subf %3, %14 : vector<64x128xf32>
    %16 = vector.broadcast %13 : vector<64x1xf32> to vector<64x128xf32>
    %17 = arith.subf %6, %16 : vector<64x128xf32>
    %18 = arith.mulf %15, %15 : vector<64x128xf32>
    %cst_5 = arith.constant dense<0.000000e+00> : vector<64xf32>
    %19 = vector.multi_reduction <add>, %18, %cst_5 [1] : vector<64x128xf32> to vector<64xf32>
    %20 = vector.shape_cast %19 : vector<64xf32> to vector<64x1xf32>
    %21 = arith.mulf %17, %17 : vector<64x128xf32>
    %cst_6 = arith.constant dense<0.000000e+00> : vector<64xf32>
    %22 = vector.multi_reduction <add>, %21, %cst_6 [1] : vector<64x128xf32> to vector<64xf32>
    %23 = vector.shape_cast %22 : vector<64xf32> to vector<64x1xf32>
    %24 = arith.addf %20, %23 : vector<64x1xf32>
    %cst_7 = arith.constant 3.906250e-03 : f32
    %25 = vector.broadcast %cst_7 : f32 to vector<64x1xf32>
    %26 = arith.mulf %24, %25 : vector<64x1xf32>
    %cst_8 = arith.constant 9.99999974E-6 : f32
    %27 = vector.broadcast %cst_8 : f32 to vector<64x1xf32>
    %28 = arith.addf %26, %27 : vector<64x1xf32>
    %29 = math.rsqrt %28 : vector<64x1xf32>
    %30 = arith.truncf %15 : vector<64x128xf32> to vector<64x128xbf16>
    %c0_9 = arith.constant 0 : index
    %c0_10 = arith.constant 0 : index
    %31 = vector.load %arg2[%c0_9, %c0_10] : memref<128x128xbf16, #tpu.memory_space<vmem>>, vector<128x128xbf16>
    %cst_11 = arith.constant dense<0.000000e+00> : vector<64x128xf32>
    %32 = tpu.matmul %30, %31, %cst_11 {dimension_numbers = #tpu.dot_dimension_numbers<[1], [0], [0], [1], [0, 0, 1, 1], [], []>} : vector<64x128xbf16>, vector<128x128xbf16>, vector<64x128xf32> -> vector<64x128xf32>
    %33 = arith.truncf %17 : vector<64x128xf32> to vector<64x128xbf16>
    %c0_12 = arith.constant 0 : index
    %c0_13 = arith.constant 0 : index
    %34 = vector.load %arg3[%c0_12, %c0_13] : memref<128x128xbf16, #tpu.memory_space<vmem>>, vector<128x128xbf16>
    %cst_14 = arith.constant dense<0.000000e+00> : vector<64x128xf32>
    %35 = tpu.matmul %33, %34, %cst_14 {dimension_numbers = #tpu.dot_dimension_numbers<[1], [0], [0], [1], [0, 0, 1, 1], [], []>} : vector<64x128xbf16>, vector<128x128xbf16>, vector<64x128xf32> -> vector<64x128xf32>
    %36 = arith.addf %32, %35 : vector<64x128xf32>
    %37 = vector.broadcast %29 : vector<64x1xf32> to vector<64x128xf32>
    %38 = arith.mulf %37, %36 : vector<64x128xf32>
    %c0_15 = arith.constant 0 : index
    %c0_16 = arith.constant 0 : index
    %39 = vector.load %arg4[%c0_15, %c0_16] : memref<1x128xf32, #tpu.memory_space<vmem>>, vector<1x128xf32>
    %40 = vector.broadcast %39 : vector<1x128xf32> to vector<64x128xf32>
    %41 = arith.addf %38, %40 : vector<64x128xf32>
    %c0_17 = arith.constant 0 : index
    %c0_18 = arith.constant 0 : index
    %42 = vector.load %arg5[%c0_17, %c0_18] : memref<64x128xf32, #tpu.memory_space<vmem>>, vector<64x128xf32>
    tpu.vector_store %arg5[%c0_17, %c0_18], %41 {strides = array<i32>} : memref<64x128xf32, #tpu.memory_space<vmem>>, vector<64x128xf32>,
    return
  }
  func.func @transform_0(%arg0: i32) -> (i32, i32, i32, i32) {
    %c0_i32 = arith.constant 0 : i32
    %c0_i32_0 = arith.constant 0 : i32
    %c0_i32_1 = arith.constant 0 : i32
    %c0_i32_2 = arith.constant 0 : i32
    return %arg0, %c0_i32, %c0_i32_0, %c0_i32_1 : i32, i32, i32, i32
  }
  func.func @transform_1(%arg0: i32) -> (i32, i32) {
    %c0_i32 = arith.constant 0 : i32
    %c0_i32_0 = arith.constant 0 : i32
    %c0_i32_1 = arith.constant 0 : i32
    return %c0_i32, %c0_i32_0 : i32, i32
  }
  func.func @transform_2(%arg0: i32) -> (i32, i32) {
    %c0_i32 = arith.constant 0 : i32
    %c0_i32_0 = arith.constant 0 : i32
    %c0_i32_1 = arith.constant 0 : i32
    return %c0_i32, %c0_i32_0 : i32, i32
  }
  func.func @transform_3(%arg0: i32) -> (i32, i32) {
    %c0_i32 = arith.constant 0 : i32
    %c0_i32_0 = arith.constant 0 : i32
    %c0_i32_1 = arith.constant 0 : i32
    return %c0_i32, %c0_i32_0 : i32, i32
  }
  func.func @transform_4(%arg0: i32) -> (i32, i32) {
    %c0_i32 = arith.constant 0 : i32
    %c0_i32_0 = arith.constant 0 : i32
    return %arg0, %c0_i32 : i32, i32
  }
}

</mosaic_0001>

<bundles_post_ra>
// kernel: tpu_custom_call.1
= control target key start
LH: loop header
LB: loop body
LE: loop exit
PB: predicated region body
PF: predicated region fallthrough
CT: control target
= control target key end

     0   :  { %9 = vsyncpa [#allocation3], 0  ;;  %s1570_s0 = inlined_call_operand.hbm [shape: f32[16,2,8,128], index: 0, kind: input, shape index: {}]   ;;  %s1571_s1 = inlined_call_operand.hbm [shape: bf16[128,128], index: 1, kind: input, shape index: {}]   ;;  %s1572_s2 = inlined_call_operand.hbm [shape: bf16[128,128], index: 2, kind: input, shape index: {}]   ;;  %s1573_s3 = inlined_call_operand.vmem [shape: f32[1,128], index: 3, kind: input, shape index: {}]   ;;  %s1574_s4 = inlined_call_operand.hbm [shape: f32[128,128], index: 4, kind: output, shape index: {}]  }
   0x1   :  { %11 = vsyncpa [#allocation3 + $0x1], 0 }
   0x2   :  { %12 = vsyncpa [#allocation6], 0 }
   0x3   :  { %13 = vsyncpa [#allocation4], 0 }
   0x4   :  { %15 = vsyncpa [#allocation4 + $0x1], 0  ;;  %s1229_s15 = smov 0   ;;  %s1231_s16 = smov 0  }
   0x5   :  { %s1233_s17 = smov 0   ;;  %s1235_s18 = smov 0  }
   0x6 LB: > { %s1250_s19 = sadd.s32 4294967295, %s1192_s18   ;;  %s812_s20 = sadd.s32 4294967294, %s1192_s18   ;;  %s1192_s18 = sphi %s1235_s18, %s1594_s18   ;;  %s1188_s17 = sphi %s1233_s17, %s1593_s17   ;;  %s1184_s16 = sphi %s1231_s16, %s1592_s16   ;;  %s1180_s15 = sphi %s1229_s15, %s1591_s15  }
   0x7   : > { %p41_p0 = scmp.ne.s32.totalorder %s1184_s16, %s1180_s15  ;;  %p1575_p1 = scmp.eq.s32.totalorder %s1250_s19, 0 }
   0x8   : > { %p134_p3 = scmp.eq.s32.totalorder %s812_s20, 1  ;;  %p813_p5 = scmp.ge.s32.totalorder %s1192_s18, 1 }
   0x9   : > { %p1259_p4 = por %p1575_p1, %p41_p0  ;;  %p141_p7 = scmp.lt.s32.totalorder %s1192_s18, 3 }
   0xa   : > { %p1264_p6 = por %p134_p3, %p41_p0  ;;  %s1194_s24 = smov [#allocation5]  }
   0xb   : > { %s1578_s21 = scalar_select %p1259_p4, 1, 0 }
   0xc   : > { %s1579_s22 = scalar_select %p1264_p6, 1, 0 }
   0xd   : > { %p1269_p8 = pnand %p813_p5, %p141_p7  ;;  %s153_s25 = sshll.u32 %s1194_s24, 4  ;;  %s1273_s25 = int_to_ptr.vmem [resolvable:$true] %s153_s25 }
   0xe   : > { %s1195_s27 = smov [#allocation7]   ;;  %s1036_s5 = scalar_lea.hbm %s1571_s1, 1024 }
   0xf   : > { %p943_p9 = pneg %p1269_p8  ;;  %s166_s28 = sshll.u32 %s1195_s27, 4  ;;  %s1284_s28 = int_to_ptr.vmem [resolvable:$true] %s166_s28 }
  0x10   : > { %p1037_p12 = scmp.ne.s32.totalorder %s1571_s1, %s1036_s5  ;;  %p1043_p5 = scmp.lt.u32.totalorder %s1036_s5, %s1571_s1 }
  0x11   : > { %p1280_p11 = pnand %p943_p9, %p1575_p1 }
  0x13   : > { %p1038_p13 = pneg %p1280_p11 }
  0x15   : > { %p1039_p0 = pnand %p1038_p13, %p1037_p12 }
  0x17   : > { %p1040_p3 = pneg %p1039_p0 }
  0x19   : > { %p1045_p7 = pnand %p1043_p5, %p1040_p3 }
  0x1b   : > { %1048 = shalt.err (!%p1045_p7)
}
  0x1c   : > { %s1049_s10 = scalar_lea.vmem %s1273_s25, 1024  ;;  %p1057_p2 = scmp.lt.s32.totalorder %s1273_s25, %s1273_s25 }
  0x1d   : > { %p1050_p9 = scmp.ne.s32.totalorder %s1273_s25, %s1049_s10  ;;  %p1058_p12 = scmp.lt.s32.totalorder %s1049_s10, %s1049_s10 }
  0x1f   : > { %p1052_p10 = pnand %p1050_p9, %p1038_p13  ;;  %p1059_p0 = por %p1058_p12, %p1057_p2 }
  0x21   : > { %p1053_p1 = pneg %p1052_p10 }
  0x23   : > { %p1060_p6 = pnand %p1059_p0, %p1053_p1 }
  0x25   : > { %1063 = shalt.err (!%p1060_p6)
}
  0x26   : > { %s1196_s11 = smov 64   ;;  %s1197_s12 = smov 4  }
  0x27   : > { %946 = dma.hbm_to_vmem [thread:$0]  (!%p1280_p11), %s1571_s1, 1024, %s1273_s25, [#allocation6], %s1196_s11, %s1196_s11, %s1197_s12  }
  0x28   : > { %s1064_s27 = scalar_lea.hbm %s1572_s2, 1024 }
  0x29   : > { %p1065_p2 = scmp.ne.s32.totalorder %s1572_s2, %s1064_s27  ;;  %p1071_p10 = scmp.lt.u32.totalorder %s1064_s27, %s1572_s2 }
  0x2b   : > { %p1067_p1 = pnand %p1065_p2, %p1038_p13 }
  0x2d   : > { %p1068_p6 = pneg %p1067_p1 }
  0x2f   : > { %p1073_p3 = pnand %p1071_p10, %p1068_p6 }
  0x31   : > { %1076 = shalt.err (!%p1073_p3)
}
  0x32   : > { %s1077_s25 = scalar_lea.vmem %s1284_s28, 1024  ;;  %p1085_p12 = scmp.lt.s32.totalorder %s1284_s28, %s1284_s28 }
  0x33   : > { %p1078_p5 = scmp.ne.s32.totalorder %s1284_s28, %s1077_s25  ;;  %p1086_p0 = scmp.lt.s32.totalorder %s1077_s25, %s1077_s25 }
  0x35   : > { %p1080_p7 = pnand %p1078_p5, %p1038_p13  ;;  %p1087_p2 = por %p1086_p0, %p1085_p12 }
  0x37   : > { %p1081_p9 = pneg %p1080_p7 }
  0x39   : > { %p1088_p1 = pnand %p1087_p2, %p1081_p9 }
  0x3b   : > { %1091 = shalt.err (!%p1088_p1)
}
  0x3c   : > { %949 = dma.hbm_to_vmem [thread:$0]  (!%p1280_p11), %s1572_s2, 1024, %s1284_s28, [#allocation6], %s1196_s11, %s1196_s11, %s1197_s12  }
  0x3d   : > { %s1339_s9 = sadd.s32 1, %s1192_s18   ;;  %s28_s26 = sadd.s32 1, %s1188_s17 }
  0x3e   : > { %s25_s10 = ssub.s32 %s1192_s18, %s1339_s9  ;;  %p35_p13 = scmp.ne.s32.totalorder %s1188_s17, %s1184_s16 }
  0x3f   : > { %p26_p6 = scmp.eq.s32.totalorder %s25_s10, 0  ;;  %p36_p10 = scmp.eq.s32.totalorder %s1192_s18, 0 }
  0x40   : > { %p1582_p3 = scmp.eq.s32.totalorder %s1250_s19, 1  ;;  %p960_p7 = scmp.lt.s32.totalorder %s1192_s18, 2 }
  0x41   : > { %s1355_s14 = scalar_select %p26_p6, %s1188_s17, %s28_s26  }
  0x42   : > { %p1349_p5 = por %p1582_p3, %p35_p13  ;;  %p37_p9 = por %p36_p10, %p35_p13 }
  0x43   : > { %s183_s20 = sand.u32 1, %s1188_s17   ;;  %s849_s28 = sshll.u32 %s1192_s18, 11 }
  0x44   : > { %s1583_s13 = scalar_select %p1349_p5, 1, 0 }
  0x45   : > { %s817_s24 = sshll.u32 %s183_s20, 7  ;;  %s1362_s27 = scalar_lea.hbm %s1570_s0, %s849_s28 }
  0x46   : > { %s187_s29 = scalar_lea.vmem [#allocation2], %s817_s24  ;;  %p1366_p11 = pnand %p960_p7, %p37_p9 }
  0x47   : > { %s195_s30 = sshll.u32 %s187_s29, 4  ;;  %s1370_s6 = scalar_lea.sflag [#allocation3], %s183_s20  ;;  %s1364_s30 = int_to_ptr.vmem [resolvable:$true] %s195_s30 }
  0x48   : > { %s1092_s25 = scalar_lea.hbm %s1362_s27, 2048  ;;  %p1094_p0 = pneg %p1366_p11 }
  0x49   : > { %p1093_p12 = scmp.ne.s32.totalorder %s1362_s27, %s1092_s25  ;;  %s1097_s26 = scalar_lea.hbm %s1570_s0, 4096 }
  0x4a   : > { %p1098_p13 = scmp.lt.u32.totalorder %s1362_s27, %s1570_s0  ;;  %p1099_p6 = scmp.lt.u32.totalorder %s1097_s26, %s1092_s25 }
  0x4b   : > { %p1095_p2 = pnand %p1094_p0, %p1093_p12  ;;  %p1101_p3 = scmp.lt.u32.totalorder %s1092_s25, %s1362_s27 }
  0x4c   : > { %p1100_p10 = por %p1099_p6, %p1098_p13 }
  0x4d   : > { %p1096_p1 = pneg %p1095_p2 }
  0x4e   : > { %p1102_p7 = por %p1101_p3, %p1100_p10 }
  0x50   : > { %p1103_p9 = pnand %p1102_p7, %p1096_p1 }
  0x52   : > { %1106 = shalt.err (!%p1103_p9)
}
  0x53   : > { %s1107_s20 = scalar_lea.vmem %s1364_s30, 2048  ;;  %s1198_s28 = smov [#allocation2]  }
  0x54   : > { %p1108_p12 = scmp.ne.s32.totalorder %s1364_s30, %s1107_s20  ;;  %s1112_s11 = sshll.u32 %s1198_s28, 4  ;;  %s1113_s11 = int_to_ptr.vmem [resolvable:$false] %s1112_s11 }
  0x55   : > { %s1114_s12 = scalar_lea.vmem %s1113_s11, 4096  ;;  %p1115_p4 = scmp.lt.s32.totalorder %s1364_s30, %s1113_s11 }
  0x56   : > { %p1110_p2 = pnand %p1108_p12, %p1094_p0  ;;  %p1116_p13 = scmp.lt.s32.totalorder %s1114_s12, %s1107_s20 }
  0x58   : > { %p1111_p5 = pneg %p1110_p2  ;;  %p1117_p6 = por %p1116_p13, %p1115_p4 }
  0x5a   : > { %p1118_p10 = pnand %p1117_p6, %p1111_p5 }
  0x5c   : > { %1121 = shalt.err (!%p1118_p10)
}
  0x5d   : > { %s1199_s29 = smov 128   ;;  %s1200_s25 = smov 8  }
  0x5e   : > { %953 = dma.hbm_to_vmem [thread:$0]  (!%p1366_p11), %s1362_s27, 2048, %s1364_s30, %s1370_s6, %s1199_s29, %s1199_s29, %s1200_s25  }
  0x5f   : > { %207 = sbr.rel (%p1269_p8) target bundleno = 522 (0x20a), region = 36  ;;  %s1401_s7 = sand.u32 (!%p1269_p8), 1, %s1184_s16  }
  0x60   : > { %s822_s8 = sshll.u32 (!%p1269_p8), %s1401_s7, 7  ;;  %s210_s26 = scalar_lea.sflag (!%p1269_p8), [#allocation3], %s1401_s7 }
  0x61   : > { %s1405_s10 = scalar_lea.vmem (!%p1269_p8), [#allocation2], %s822_s8  ;;  %p1585_p4 = scmp.ne.s32.totalorder (!%p1269_p8), %s1578_s21, 0 }
  0x66   : > { %1167 = dma.done.wait (%p1585_p4), %s210_s26, 2048  }
  0x67   : > { %1169 = vsyncadd (%p1585_p4), %s210_s26, 4294965248  ;;  %p1586_p5 = scmp.eq.s32.totalorder %s1250_s19, 0 }
  0x69   : > { %1171 = dma.done.wait (%p1586_p5), [#allocation6], 2048   ;;  %p1587_p8 = pmov %p1586_p5 }
  0x6a   : > { %v1416_v0 = vld [vmem:[%s1405_s10 + $0x8] sm:$0xff]  ;;  %v1419_v1 = vld [vmem:[%s1405_s10] sm:$0xff]  ;;  %v1424_v2 = vld [vmem:[%s1405_s10 + $0x18] sm:$0xff]  ;;  %s825_s21 = sshll.u32 %s1401_s7, 6  ;;  %s850_s5 = sshll.u32 %s1250_s19, 10 }
  0x6b   : > { %1173 = vsyncadd (%p1587_p8), [#allocation6], 4294965248  ;;  %281 = vadd.xlane.f32.xlu1 %v1416_v0  ;;  %265 = vadd.xlane.f32.xlu0 %v1419_v1  ;;  %v1427_v3 = vld [vmem:[%s1405_s10 + $0x10] sm:$0xff]  ;;  %v1435_v5 = vld [vmem:[%s1405_s10 + $0x20] sm:$0xff]  ;;  %s1509_s30 = scalar_lea.vmem [#allocation8], %s825_s21  ;;  %s1521_s28 = scalar_lea.hbm %s1574_s4, %s850_s5 }
  0x6c   : > { %v1430_v4 = vld [vmem:[%s1405_s10 + $0x30] sm:$0xff]  ;;  %v1004_v6 = vld [vmem:[#allocation7] sm:$0xff]   ;;  %v1438_v8 = vld [vmem:[%s1405_s10 + $0x38] sm:$0xff]  ;;  %s720_s6 = sshll.u32 %s1509_s30, 4  ;;  %s707_s19 = scalar_lea.sflag [#allocation4], %s1401_s7  ;;  %s1523_s6 = int_to_ptr.vmem [resolvable:$true] %s720_s6 }
  0x6d   : > { %v1005_v7 = vld [vmem:[#allocation5] sm:$0xff]   ;;  %v1441_v9 = vld [vmem:[%s1405_s10 + $0x28] sm:$0xff]  ;;  %875 = vmatprep.subr.bf16.mxu1 %v1004_v6  ;;  %v1008_v12 = vld [vmem:[#allocation7 + $0x10] sm:$0xff]   ;;  %s1122_s11 = scalar_lea.vmem %s1523_s6, 1024  ;;  %p1588_p0 = scmp.ne.s32.totalorder %s1583_s13, 0 }
  0x6e   : > { %v1006_v10 = vld [vmem:[#allocation7 + $0x8] sm:$0xff]   ;;  %899 = vmatprep.subr.bf16.mxu0 %v1005_v7  ;;  %876 = vmatpush3.bf16.msra.mxu1 %v1004_v6  ;;  %v1009_v13 = vld [vmem:[#allocation5 + $0x10] sm:$0xff]   ;;  %v1451_v15 = vld [vmem:[%s1405_s10 + $0x40] sm:$0xff]  ;;  %p1123_p11 = scmp.ne.s32.totalorder %s1523_s6, %s1122_s11  ;;  %s1201_s12 = smov [#allocation8]  }
  0x6f   : > { %283 = vadd.xlane.f32.xlu1 %v1424_v2  ;;  %267 = vadd.xlane.f32.xlu0 %v1427_v3  ;;  %v1007_v11 = vld [vmem:[#allocation5 + $0x8] sm:$0xff]   ;;  %v1446_v14 = vld [vmem:[%s1405_s10 + $0x50] sm:$0xff]  ;;  %v1010_v16 = vld [vmem:[#allocation7 + $0x18] sm:$0xff]   ;;  %s1126_s29 = sshll.u32 %s1201_s12, 4  ;;  %s1127_s29 = int_to_ptr.vmem [resolvable:$false] %s1126_s29 }
  0x70   : > { %900 = vmatpush3.bf16.msra.mxu0 %v1005_v7  ;;  %877 = vmatprep.subr.bf16.mxu1 %v1006_v10  ;;  %v1011_v17 = vld [vmem:[#allocation5 + $0x18] sm:$0xff]   ;;  %v1459_v19 = vld [vmem:[%s1405_s10 + $0x48] sm:$0xff]  ;;  %v1012_v20 = vld [vmem:[#allocation7 + $0x20] sm:$0xff]   ;;  %p1124_p1 = pnand %p1123_p11, %p1588_p0  ;;  %s1128_s25 = scalar_lea.vmem %s1127_s29, 2048 }
  0x71   : > { %901 = vmatprep.subr.bf16.mxu0 %v1007_v11  ;;  %v1456_v18 = vld [vmem:[%s1405_s10 + $0x58] sm:$0xff]  ;;  %v1013_v21 = vld [vmem:[#allocation5 + $0x20] sm:$0xff]   ;;  %v1464_v22 = vld [vmem:[%s1405_s10 + $0x70] sm:$0xff]  ;;  %p1129_p7 = scmp.lt.s32.totalorder %s1523_s6, %s1127_s29  ;;  %p1130_p9 = scmp.lt.s32.totalorder %s1128_s25, %s1122_s11 }
  0x72   : > { %878 = vmatpush3.bf16.msra.mxu1 %v1006_v10  ;;  %v1467_v23 = vld [vmem:[%s1405_s10 + $0x60] sm:$0xff]  ;;  %v1014_v24 = vld [vmem:[#allocation7 + $0x28] sm:$0xff]   ;;  %v1472_v26 = vld [vmem:[%s1405_s10 + $0x78] sm:$0xff]  ;;  %p1125_p3 = pneg %p1124_p1 }
  0x73   : > { %271 = vadd.xlane.f32.xlu1 %v1430_v4  ;;  %269 = vadd.xlane.f32.xlu0 %v1435_v5  ;;  %v1015_v25 = vld [vmem:[#allocation5 + $0x28] sm:$0xff]   ;;  %v1016_v28 = vld [vmem:[#allocation7 + $0x30] sm:$0xff]   ;;  %v1018_v30 = vld [vmem:[#allocation7 + $0x38] sm:$0xff]   ;;  %p1131_p12 = por %p1130_p9, %p1129_p7 }
  0x74   : > { %902 = vmatpush3.bf16.msra.mxu0 %v1007_v11  ;;  %879 = vmatprep.subr.bf16.mxu1 %v1008_v12  ;;  %v1475_v27 = vld [vmem:[%s1405_s10 + $0x68] sm:$0xff]  ;;  %v1017_v29 = vld [vmem:[#allocation5 + $0x30] sm:$0xff]   ;;  %v1019_v31 = vld [vmem:[#allocation5 + $0x38] sm:$0xff]  }
  0x75   : > { %903 = vmatprep.subr.bf16.mxu0 %v1009_v13  ;;  %p1132_p2 = pnand %p1131_p12, %p1125_p3 }
  0x76   : > { %880 = vmatpush3.bf16.msra.mxu1 %v1008_v12 }
  0x77   : > { %287 = vadd.xlane.f32.xlu1 %v1438_v8  ;;  %285 = vadd.xlane.f32.xlu0 %v1441_v9 }
  0x78   : > { %904 = vmatpush3.bf16.msra.mxu0 %v1009_v13  ;;  %881 = vmatprep.subr.bf16.mxu1 %v1010_v16 }
  0x79   : > { %905 = vmatprep.subr.bf16.mxu0 %v1011_v17 }
  0x7a   : > { %882 = vmatpush3.bf16.msra.mxu1 %v1010_v16 }
  0x7b   : > { %275 = vadd.xlane.f32.xlu1 %v1446_v14  ;;  %273 = vadd.xlane.f32.xlu0 %v1451_v15 }
  0x7c   : > { %906 = vmatpush3.bf16.msra.mxu0 %v1011_v17  ;;  %883 = vmatprep.subr.bf16.mxu1 %v1012_v20 }
  0x7d   : > { %907 = vmatprep.subr.bf16.mxu0 %v1013_v21 }
  0x7e   : > { %884 = vmatpush3.bf16.msra.mxu1 %v1012_v20 }
  0x7f   : > { %291 = vadd.xlane.f32.xlu1 %v1456_v18  ;;  %289 = vadd.xlane.f32.xlu0 %v1459_v19 }
  0x80   : > { %908 = vmatpush3.bf16.msra.mxu0 %v1013_v21  ;;  %885 = vmatprep.subr.bf16.mxu1 %v1014_v24 }
  0x81   : > { %909 = vmatprep.subr.bf16.mxu0 %v1015_v25 }
  0x82   : > { %886 = vmatpush3.bf16.msra.mxu1 %v1014_v24 }
  0x83   : > { %279 = vadd.xlane.f32.xlu1 %v1464_v22  ;;  %277 = vadd.xlane.f32.xlu0 %v1467_v23 }
  0x84   : > { %910 = vmatpush3.bf16.msra.mxu0 %v1015_v25  ;;  %887 = vmatprep.subr.bf16.mxu1 %v1016_v28 }
  0x85   : > { %911 = vmatprep.subr.bf16.mxu0 %v1017_v29 }
  0x86   : > { %888 = vmatpush3.bf16.msra.mxu1 %v1016_v28 }
  0x87   : > { %295 = vadd.xlane.f32.xlu1 %v1472_v26  ;;  %293 = vadd.xlane.f32.xlu0 %v1475_v27 }
  0x88   : > { %912 = vmatpush3.bf16.msra.mxu0 %v1017_v29  ;;  %889 = vmatprep.subr.bf16.mxu1 %v1018_v30 }
  0x89   : > { %913 = vmatprep.subr.bf16.mxu0 %v1019_v31 }
  0x8a   : > { %890 = vmatpush3.bf16.msra.mxu1 %v1018_v30 }
  0x8c   : > { %914 = vmatpush3.bf16.msra.mxu0 %v1019_v31 }
  0xf8   : > { %v282_v32 = vpop.xlane.xlu1 %281  ;;  %v266_v33 = vpop.xlane.xlu0 %265 }
  0xf9   : > { %v297_v34 = vadd.f32 %v282_v32, %v266_v33 }
  0xfb   : > { %v305_v35 = vmul.f32 0.00390625, %v297_v34 }
  0xfc   : > { %v284_v36 = vpop.xlane.xlu1 %283  ;;  %v268_v37 = vpop.xlane.xlu0 %267 }
  0xfd   : > { %v313_v38 = vsub.f32 %v1419_v1, %v305_v35  ;;  %v298_v39 = vadd.f32 %v284_v36, %v268_v37  ;;  %v1481_v44 = vsub.f32 %v1416_v0, %v305_v35 }
  0xff   : > { %v306_v40 = vmul.f32 0.00390625, %v298_v39  ;;  %v329_v41 = vmul.f32 %v313_v38, %v313_v38 }
 0x100   : > { %v272_v42 = vpop.xlane.xlu1 %271  ;;  %v270_v43 = vpop.xlane.xlu0 %269 }
 0x101   : > { %337 = vadd.xlane.f32.xlu0 %v329_v41  ;;  %v1484_v45 = vsub.f32 %v1424_v2, %v306_v40  ;;  %v314_v46 = vsub.f32 %v1427_v3, %v306_v40 }
 0x103   : > { %v429_v47 = vpack.c.bf16 %v1484_v45, %v1481_v44  ;;  %v409_v48 = vpack.c.bf16 %v314_v46, %v313_v38  ;;  %v330_v49 = vmul.f32 %v314_v46, %v314_v46  ;;  %v354_v36 = vmul.f32 %v1484_v45, %v1484_v45 }
 0x104   : > { %v288_v50 = vpop.xlane.xlu1 %287  ;;  %v286_v51 = vpop.xlane.xlu0 %285 }
 0x105   : > { %v300_v52 = vadd.f32 %v288_v50, %v272_v42  ;;  %v299_v53 = vadd.f32 %v286_v51, %v270_v43  ;;  %891 = vmatprep.mubr.bf16.mxu1 %v429_v47  ;;  %915 = vmatprep.mubr.bf16.mxu0 %v409_v48 }
 0x106   : > { %339 = vadd.xlane.f32.xlu1 %v330_v49 }
 0x107   : > { %v308_v54 = vmul.f32 0.00390625, %v300_v52  ;;  %v307_v55 = vmul.f32 0.00390625, %v299_v53 }
 0x108   : > { %v276_v56 = vpop.xlane.xlu1 %275  ;;  %v274_v57 = vpop.xlane.xlu0 %273 }
 0x109   : > { %v316_v58 = vsub.f32 %v1430_v4, %v308_v54  ;;  %v324_v59 = vsub.f32 %v1438_v8, %v308_v54  ;;  %v315_v60 = vsub.f32 %v1435_v5, %v307_v55  ;;  %v323_v61 = vsub.f32 %v1441_v9, %v307_v55 }
 0x10b   : > { %v332_v62 = vmul.f32 %v316_v58, %v316_v58  ;;  %v430_v63 = vpack.c.bf16 %v324_v59, %v323_v61  ;;  %v410_v0 = vpack.c.bf16 %v316_v58, %v315_v60  ;;  %v331_v1 = vmul.f32 %v315_v60, %v315_v60 }
 0x10c   : > { %v292_v2 = vpop.xlane.xlu1 %291  ;;  %v290_v3 = vpop.xlane.xlu0 %289 }
 0x10d   : > { %v302_v6 = vadd.f32 %v292_v2, %v276_v56  ;;  %v301_v7 = vadd.f32 %v290_v3, %v274_v57  ;;  %343 = vadd.xlane.f32.xlu1 %v332_v62  ;;  %892 = vmatmul.mubr.bf16.vlgmr.msra.gmra.mrb[0].mxu1 %v430_v63 }
 0x10e   : > { %916 = vmatmul.mubr.bf16.vlgmr.msra.gmra.mrb[0].mxu0 %v410_v0  ;;  %341 = vadd.xlane.f32.xlu0 %v331_v1 }
 0x10f   : > { %v310_v10 = vmul.f32 0.00390625, %v302_v6  ;;  %v309_v4 = vmul.f32 0.00390625, %v301_v7 }
 0x110   : > { %v280_v11 = vpop.xlane.xlu1 %279  ;;  %v278_v8 = vpop.xlane.xlu0 %277 }
 0x111   : > { %v318_v5 = vsub.f32 %v1446_v14, %v310_v10  ;;  %v326_v9 = vsub.f32 %v1456_v18, %v310_v10  ;;  %v317_v12 = vsub.f32 %v1451_v15, %v309_v4  ;;  %v325_v13 = vsub.f32 %v1459_v19, %v309_v4 }
 0x113   : > { %v334_v16 = vmul.f32 %v318_v5, %v318_v5  ;;  %v431_v17 = vpack.c.bf16 %v326_v9, %v325_v13  ;;  %v411_v20 = vpack.c.bf16 %v318_v5, %v317_v12  ;;  %v333_v21 = vmul.f32 %v317_v12, %v317_v12 }
 0x114   : > { %v296_v24 = vpop.xlane.xlu1 %295  ;;  %v294_v25 = vpop.xlane.xlu0 %293  ;;  %v357_v37 = vmul.f32 %v325_v13, %v325_v13 }
 0x115   : > { %v304_v28 = vadd.f32 %v296_v24, %v280_v11  ;;  %v303_v29 = vadd.f32 %v294_v25, %v278_v8  ;;  %347 = vadd.xlane.f32.xlu1 %v334_v16  ;;  %895 = vmatprep.mubr.bf16.mxu1 %v431_v17  ;;  %v842_v24 = vld [vmem:[%s1573_s3] ss:$0 sm:$0xff] }
 0x116   : > { %919 = vmatprep.mubr.bf16.mxu0 %v411_v20  ;;  %345 = vadd.xlane.f32.xlu0 %v333_v21 }
 0x117   : > { %v312_v30 = vmul.f32 0.00390625, %v304_v28  ;;  %v311_v14 = vmul.f32 0.00390625, %v303_v29 }
 0x119   : > { %v320_v18 = vsub.f32 %v1464_v22, %v312_v30  ;;  %v328_v15 = vsub.f32 %v1472_v26, %v312_v30  ;;  %v319_v19 = vsub.f32 %v1467_v23, %v311_v14  ;;  %v327_v31 = vsub.f32 %v1475_v27, %v311_v14 }
 0x11a   : > { %v353_v22 = vmul.f32 %v1481_v44, %v1481_v44  ;;  %v356_v26 = vmul.f32 %v324_v59, %v324_v59  ;;  %v355_v23 = vmul.f32 %v323_v61, %v323_v61  ;;  %v358_v27 = vmul.f32 %v326_v9, %v326_v9 }
 0x11b   : > { %v336_v32 = vmul.f32 %v320_v18, %v320_v18  ;;  %v432_v33 = vpack.c.bf16 %v328_v15, %v327_v31  ;;  %v412_v34 = vpack.c.bf16 %v320_v18, %v319_v19  ;;  %v335_v35 = vmul.f32 %v319_v19, %v319_v19 }
 0x11c   : > { %v360_v38 = vmul.f32 %v328_v15, %v328_v15  ;;  %v359_v39 = vmul.f32 %v327_v31, %v327_v31 }
 0x11d   : > { %351 = vadd.xlane.f32.xlu1 %v336_v32  ;;  %896 = vmatmul.mubr.bf16.gmra.mrb[4].mxu1 %v432_v33 }
 0x11e   : > { %920 = vmatmul.mubr.bf16.gmra.mrb[4].mxu0 %v412_v34  ;;  %349 = vadd.xlane.f32.xlu0 %v335_v35 }
 0x121   : > { %363 = vadd.xlane.f32.xlu1 %v354_v36 }
 0x122   : > { %361 = vadd.xlane.f32.xlu0 %v353_v22 }
 0x125   : > { %367 = vadd.xlane.f32.xlu1 %v356_v26 }
 0x126   : > { %365 = vadd.xlane.f32.xlu0 %v355_v23 }
 0x129   : > { %371 = vadd.xlane.f32.xlu1 %v358_v27 }
 0x12a   : > { %369 = vadd.xlane.f32.xlu0 %v357_v37 }
 0x12d   : > { %375 = vadd.xlane.f32.xlu1 %v360_v38 }
 0x12e   : > { %373 = vadd.xlane.f32.xlu0 %v359_v39 }
 0x18e   : > { %v338_v40 = vpop.xlane.xlu0 %337 }
 0x193   : > { %v340_v41 = vpop.xlane.xlu1 %339 }
 0x19a   : > { %v344_v43 = vpop.xlane.xlu1 %343 }
 0x19b   : > { %v342_v42 = vpop.xlane.xlu0 %341 }
 0x1a2   : > { %v348_v44 = vpop.xlane.xlu1 %347 }
 0x1a3   : > { %v346_v45 = vpop.xlane.xlu0 %345 }
 0x1aa   : > { %v352_v47 = vpop.xlane.xlu1 %351 }
 0x1ab   : > { %v350_v46 = vpop.xlane.xlu0 %349 }
 0x1ae   : > { %v364_v49 = vpop.xlane.xlu1 %363 }
 0x1af   : > { %v362_v48 = vpop.xlane.xlu0 %361  ;;  %v378_v55 = vadd.f32 %v364_v49, %v340_v41 }
 0x1b0   : > { %v377_v53 = vadd.f32 %v362_v48, %v338_v40 }
 0x1b1   : > { %v386_v59 = vmul.f32 0.00390625, %v378_v55 }
 0x1b2   : > { %v368_v51 = vpop.xlane.xlu1 %367  ;;  %v385_v57 = vmul.f32 0.00390625, %v377_v53 }
 0x1b3   : > { %v366_v50 = vpop.xlane.xlu0 %365  ;;  %v380_v54 = vadd.f32 %v368_v51, %v344_v43  ;;  %v394_v1 = vadd.f32 1e-05, %v386_v59 }
 0x1b4   : > { %v379_v52 = vadd.f32 %v366_v50, %v342_v42  ;;  %v393_v62 = vadd.f32 1e-05, %v385_v57 }
 0x1b5   : > { %v388_v58 = vmul.f32 0.00390625, %v380_v54 }
 0x1b6   : > { %v387_v56 = vmul.f32 0.00390625, %v379_v52  ;;  %v372_v63 = vpop.xlane.xlu1 %371 }
 0x1b7   : > { %v370_v60 = vpop.xlane.xlu0 %369  ;;  %v396_v0 = vadd.f32 1e-05, %v388_v58  ;;  %v382_v4 = vadd.f32 %v372_v63, %v348_v44 }
 0x1b8   : > { %v395_v61 = vadd.f32 1e-05, %v387_v56  ;;  %v381_v7 = vadd.f32 %v370_v60, %v346_v45 }
 0x1b9   : > { %v390_v14 = vmul.f32 0.00390625, %v382_v4 }
 0x1ba   : > { %1020 = vrsqrt.f32 %v395_v61  ;;  %v376_v3 = vpop.xlane.xlu1 %375  ;;  %v389_v12 = vmul.f32 0.00390625, %v381_v7 }
 0x1bb   : > { %1022 = vrsqrt.f32 %v393_v62  ;;  %v374_v2 = vpop.xlane.xlu0 %373  ;;  %v384_v10 = vadd.f32 %v376_v3, %v352_v47  ;;  %v398_v38 = vadd.f32 1e-05, %v390_v14 }
 0x1bc   : > { %1024 = vrsqrt.f32 %v396_v0  ;;  %v383_v6 = vadd.f32 %v374_v2, %v350_v46  ;;  %v397_v36 = vadd.f32 1e-05, %v389_v12 }
 0x1bd   : > { %1026 = vrsqrt.f32 %v394_v1  ;;  %v392_v21 = vmul.f32 0.00390625, %v384_v10 }
 0x1be   : > { %v391_v8 = vmul.f32 0.00390625, %v383_v6 }
 0x1bf   : > { %v400_v23 = vadd.f32 1e-05, %v392_v21 }
 0x1c0   : > { %v399_v32 = vadd.f32 1e-05, %v391_v8 }
 0x1c2   : > { %1028 = vrsqrt.f32 %v399_v32 }
 0x1c3   : > { %1030 = vrsqrt.f32 %v397_v36 }
 0x1c4   : > { %v1021_v20 = vpop.eup %1020  ;;  %1032 = vrsqrt.f32 %v400_v23 }
 0x1c5   : > { %v1023_v30 = vpop.eup %1022  ;;  %1034 = vrsqrt.f32 %v398_v38 }
 0x1c6   : > { %v1025_v31 = vpop.eup %1024 }
 0x1c7   : > { %v1027_v35 = vpop.eup %1026 }
 0x1cc   : > { %v1029_v47 = vpop.eup %1028 }
 0x1cd   : > { %v1031_v51 = vpop.eup %1030 }
 0x1ce   : > { %v1033_v55 = vpop.eup %1032 }
 0x1cf   : > { %v1035_v58 = vpop.eup %1034 }
 0x1e0   : > { %v893_v11 = vpop.f32.mrb[0].mxu1 }
 0x1e1   : > { %v917_v5 = vpop.f32.mrb[0].mxu0  ;;  %v531_v9 = vpop.f32.mrb[1].mxu1 }
 0x1e2   : > { %v653_v13 = vadd.f32 %v917_v5, %v893_v11  ;;  %v644_v16 = vpop.f32.mrb[1].mxu0  ;;  %v894_v17 = vpop.f32.mrb[2].mxu1 }
 0x1e3   : > { %v645_v25 = vadd.f32 %v644_v16, %v531_v9  ;;  %v918_v28 = vpop.f32.mrb[2].mxu0  ;;  %v534_v29 = vpop.f32.mrb[3].mxu1 }
 0x1e4   : > { %v677_v18 = vmul.f32 %v1021_v20, %v653_v13  ;;  %v656_v15 = vadd.f32 %v918_v28, %v894_v17  ;;  %v647_v19 = vpop.f32.mrb[3].mxu0 }
 0x1e5   : > { %v675_v33 = vmul.f32 %v1023_v30, %v645_v25  ;;  %v648_v34 = vadd.f32 %v647_v19, %v534_v29 }
 0x1e6   : > { %v692_v22 = vadd.f32 %v842_v24, %v677_v18  ;;  %v678_v26 = vmul.f32 %v1025_v31, %v656_v15 }
 0x1e7   : > { %v690_v27 = vadd.f32 %v842_v24, %v675_v33  ;;  %v676_v37 = vmul.f32 %v1027_v35, %v648_v34 }
 0x1e8   : > { %700 = vst [vmem:[%s1509_s30 + $0x10] sm:$0xff] %v692_v22  ;;  %v693_v39 = vadd.f32 %v842_v24, %v678_v26 }
 0x1e9   : > { %698 = vst [vmem:[%s1509_s30] sm:$0xff] %v690_v27  ;;  %v691_v40 = vadd.f32 %v842_v24, %v676_v37 }
 0x1ea   : > { %701 = vst [vmem:[%s1509_s30 + $0x18] sm:$0xff] %v693_v39 }
 0x1eb   : > { %699 = vst [vmem:[%s1509_s30 + $0x8] sm:$0xff] %v691_v40 }
 0x1f0   : > { %v897_v41 = vpop.f32.mrb[4].mxu1 }
 0x1f1   : > { %v921_v42 = vpop.f32.mrb[4].mxu0  ;;  %v547_v43 = vpop.f32.mrb[5].mxu1 }
 0x1f2   : > { %v669_v45 = vadd.f32 %v921_v42, %v897_v41  ;;  %v660_v44 = vpop.f32.mrb[5].mxu0  ;;  %v898_v46 = vpop.f32.mrb[6].mxu1 }
 0x1f3   : > { %v661_v48 = vadd.f32 %v660_v44, %v547_v43  ;;  %v922_v49 = vpop.f32.mrb[6].mxu0  ;;  %v550_v50 = vpop.f32.mrb[7].mxu1 }
 0x1f4   : > { %v681_v52 = vmul.f32 %v1029_v47, %v669_v45  ;;  %v672_v53 = vadd.f32 %v922_v49, %v898_v46  ;;  %v663_v54 = vpop.f32.mrb[7].mxu0 }
 0x1f5   : > { %v679_v56 = vmul.f32 %v1031_v51, %v661_v48  ;;  %v664_v57 = vadd.f32 %v663_v54, %v550_v50 }
 0x1f6   : > { %v696_v59 = vadd.f32 %v842_v24, %v681_v52  ;;  %v682_v60 = vmul.f32 %v1033_v55, %v672_v53 }
 0x1f7   : > { %v694_v61 = vadd.f32 %v842_v24, %v679_v56  ;;  %v680_v62 = vmul.f32 %v1035_v58, %v664_v57 }
 0x1f8   : > { %704 = vst [vmem:[%s1509_s30 + $0x30] sm:$0xff] %v696_v59  ;;  %v697_v63 = vadd.f32 %v842_v24, %v682_v60 }
 0x1f9   : > { %702 = vst [vmem:[%s1509_s30 + $0x20] sm:$0xff] %v694_v61  ;;  %v695_v0 = vadd.f32 %v842_v24, %v680_v62 }
 0x1fa   : > { %705 = vst [vmem:[%s1509_s30 + $0x38] sm:$0xff] %v697_v63 }
 0x1fb   : > { %703 = vst [vmem:[%s1509_s30 + $0x28] sm:$0xff] %v695_v0 }
 0x1fc   : > { %1135 = shalt.err (!%p1132_p2)
}
 0x1fd   : > { %s1136_s8 = scalar_lea.hbm %s1521_s28, 1024  ;;  %s1140_s21 = scalar_lea.hbm %s1574_s4, 2048 }
 0x1fe   : > { %p1137_p13 = scmp.ne.s32.totalorder %s1521_s28, %s1136_s8  ;;  %p1141_p4 = scmp.lt.u32.totalorder %s1521_s28, %s1574_s4 }
 0x1ff   : > { %p1142_p5 = scmp.lt.u32.totalorder %s1140_s21, %s1136_s8  ;;  %p1144_p11 = scmp.lt.u32.totalorder %s1136_s8, %s1521_s28 }
 0x200   : > { %p1138_p6 = pnand %p1137_p13, %p1588_p0 }
 0x201   : > { %p1143_p8 = por %p1142_p5, %p1141_p4 }
 0x202   : > { %p1139_p10 = pneg %p1138_p6 }
 0x203   : > { %p1145_p1 = por %p1144_p11, %p1143_p8 }
 0x205   : > { %p1146_p3 = pnand %p1145_p1, %p1139_p10 }
 0x207   : > { %1149 = shalt.err (!%p1146_p3)
}
 0x208   : > { %s1202_s30 = smov 128   ;;  %s1203_s5 = smov 8  }
 0x209   : > { %941 = dma.vmem_to_hbm [thread:$0]  (%p1588_p0), %s1523_s6, 1024, %s1521_s28, %s707_s19, %s1202_s30, %s1202_s30, %s1203_s5  }
 0x20a PF: > { %s735_s24 = sand.u32 1, %s1180_s15   ;;  %p1589_p7 = scmp.ne.s32.totalorder %s1579_s22, 0 }
 0x20b   : > { %p1590_p9 = scmp.ge.s32.totalorder %s1192_s18, 2  ;;  %s736_s20 = scalar_lea.sflag [#allocation4], %s735_s24 }
 0x20d   : > { %p955_p12 = pnand %p1590_p9, %p1589_p7 }
 0x20f   : > { %1175 = dma.done.wait (!%p955_p12), %s736_s20, 1024  }
 0x210   : > { %1177 = vsyncadd (!%p955_p12), %s736_s20, 4294966272  ;;  %p18_p2 = scmp.ge.s32.totalorder %s1339_s9, 4   ;;  %s1591_s15 = smov %s1184_s16 }
 0x211   : > { %s1592_s16 = smov %s1188_s17  ;;  %s1593_s17 = smov %s1355_s14 }
 0x212   : > { %s1594_s18 = smov %s1339_s9  ;;  %20 = sbr.rel (!%p18_p2) target bundleno = 6 (0x6), region = 89 }
 0x219   :  { %741 = vsyncpa [#allocation3], 1 }
 0x21a   :  { %743 = vsyncpa [#allocation3 + $0x1], 1 }
 0x21b   :  { %744 = vsyncpa [#allocation6], 1 }
 0x21c   :  { %745 = vsyncpa [#allocation4], 1 }
 0x21d   :  { %747 = vsyncpa [#allocation4 + $0x1], 1 }

</bundles_post_ra>
